<compile_context>
chip_gen: v5e
topology: v5e:2x2
jax: 0.10.0
libtpu: 0.0.40
codegen_flags: <defaults>
</compile_context>

<pallas_src>
import functools

import jax
import jax.numpy as jnp
from jax.experimental import pallas as pl
from jax.experimental.pallas import tpu as pltpu

CSI_DIM = 108
POSE_DIM = 5
ACTION_DIM = 5
IN_DIM = CSI_DIM + POSE_DIM + ACTION_DIM  # 118
CONCAT_K = 128                            # IN_DIM zero-padded to one lane tile
H1 = IN_DIM   # 118
H2 = 50
H3 = 10
OUT_DIM = 2


def _round_up(x, m):
    return (x + m - 1) // m * m


def _make_mlp_kernel(compute_dtype):
    """Fused MLP hot path: in-VMEM concat + 4 MXU dots + biases + 3 ReLUs."""

    def kernel(csi_ref, pa_ref,
               w1_ref, b1_ref, w2_ref, b2_ref, w3_ref, b3_ref, w4_ref, b4_ref,
               o_ref, concat_ref):
        cd = compute_dtype
        tb = concat_ref.shape[0]

        # In-VMEM concat([csi, pose, action]) -> single K-lane-tile fc1 dot.
        # Padded lanes [118:128) are zeroed every step (scratch is uninitialized;
        # W1's padded rows are zero too, but 0 * NaN garbage would still be NaN).
        concat_ref[:, :CSI_DIM] = csi_ref[...].astype(cd)
        concat_ref[:, CSI_DIM:IN_DIM] = pa_ref[...].astype(cd)
        concat_ref[:, IN_DIM:] = jnp.zeros((tb, CONCAT_K - IN_DIM), cd)

        # fc1 (bias-add + ReLU stay f32 on the VPU).
        h = jnp.dot(concat_ref[...], w1_ref[...],
                    preferred_element_type=jnp.float32) + b1_ref[...]
        h = jnp.maximum(h, 0.0)

        # fc2
        h = jnp.dot(h.astype(cd), w2_ref[...],
                    preferred_element_type=jnp.float32) + b2_ref[...]
        h = jnp.maximum(h, 0.0)

        # fc3
        h = jnp.dot(h.astype(cd), w3_ref[...],
                    preferred_element_type=jnp.float32) + b3_ref[...]
        h = jnp.maximum(h, 0.0)

        # fc4 (logits). OUT_DIM=2 -> masked partial store; writeback is only
        # 8 B/row so the narrow output block is the right call on all gens.
        h = jnp.dot(h.astype(cd), w4_ref[...],
                    preferred_element_type=jnp.float32) + b4_ref[...]
        o_ref[...] = h.astype(o_ref.dtype)

    return kernel


@functools.partial(jax.jit, static_argnames=("block_batch", "use_bf16"))
def wifi_regrasp_forward(curr_pose, csi_ip, action, params, *,
                         block_batch=2048, use_bf16=True):
    """Matches WifiReGraspNet.forward: cat([csi, pose, action], 1) -> 4-layer MLP.

    block_batch: batch tile size (2048-4096 recommended for large batches).
    use_bf16:    bf16 MXU operands, f32 accumulation (default / native MXU path).
                 use_bf16=False keeps full-f32 operands (tight tolerance).
    """
    # Feed inputs in their native dtype (no wrapper upcast); cast happens in-kernel.
    csi = csi_ip
    # pose+action is 20 B/row -> wrapper concat is negligible HBM traffic and
    # removes one DMA stream / BlockSpec per grid step.
    pa = jnp.concatenate([curr_pose, action], axis=1)
    batch = csi.shape[0]

    (w1, b1), (w2, b2), (w3, b3), (w4, b4) = params
    compute_dtype = jnp.bfloat16 if use_bf16 else jnp.float32

    # Zero-pad W1's K axis to 128 so fc1 consumes the (tb, 128) in-kernel concat.
    w1c = jnp.zeros((CONCAT_K, H1), compute_dtype)
    w1c = w1c.at[:IN_DIM].set(w1.astype(compute_dtype))
    w2c = w2.astype(compute_dtype)
    w3c = w3.astype(compute_dtype)
    w4c = w4.astype(compute_dtype)
    # Biases stay f32 (bias-add / ReLU run on the VPU in f32; matters on v5e).
    b1f = b1.astype(jnp.float32)
    b2f = b2.astype(jnp.float32)
    b3f = b3.astype(jnp.float32)
    b4f = b4.astype(jnp.float32)

    # Batch tile: bf16 packs 16 rows per vreg -> align 16; f32 -> 8.
    align = 16 if use_bf16 else 8
    tb = max(align, min(int(block_batch), _round_up(batch, align)))
    tb = _round_up(tb, align)
    # Keep >= 2 grid steps when the batch allows it so ("parallel",) megacore
    # sharding on v7x gives both TensorCores work.
    if batch >= 2 * align and _round_up(batch, tb) // tb < 2:
        tb = _round_up((batch + 1) // 2, align)
    padded = _round_up(batch, tb)
    if padded != batch:
        pad = padded - batch
        csi = jnp.pad(csi, ((0, pad), (0, 0)))
        pa = jnp.pad(pa, ((0, pad), (0, 0)))

    grid = (padded // tb,)

    def batch_spec(feat):
        # Tiled along batch -> auto double-buffered input/output pipeline.
        return pl.BlockSpec((tb, feat), lambda i: (i, 0))

    def resident_spec(arr):
        # Full-shape block, constant block index -> DMA'd once, stays VMEM-resident.
        return pl.BlockSpec(arr.shape, lambda i: (0, 0))

    flops = 2 * padded * (IN_DIM * H1 + H1 * H2 + H2 * H3 + H3 * OUT_DIM)
    param_bytes = sum(int(a.size) * a.dtype.itemsize
                      for a in (w1c, b1f, w2c, b2f, w3c, b3f, w4c, b4f))
    in_bytes = padded * (CSI_DIM * csi.dtype.itemsize
                         + (POSE_DIM + ACTION_DIM) * pa.dtype.itemsize)
    bytes_accessed = int(in_bytes + padded * OUT_DIM * 4 + param_bytes)

    out = pl.pallas_call(
        _make_mlp_kernel(compute_dtype),
        out_shape=jax.ShapeDtypeStruct((padded, OUT_DIM), jnp.float32),
        grid=grid,
        in_specs=[
            batch_spec(CSI_DIM), batch_spec(POSE_DIM + ACTION_DIM),
            resident_spec(w1c), resident_spec(b1f),
            resident_spec(w2c), resident_spec(b2f),
            resident_spec(w3c), resident_spec(b3f),
            resident_spec(w4c), resident_spec(b4f),
        ],
        out_specs=batch_spec(OUT_DIM),
        scratch_shapes=[pltpu.VMEM((tb, CONCAT_K), compute_dtype)],
        compiler_params=pltpu.CompilerParams(
            dimension_semantics=("parallel",)),  # megacore sharding on v7x
        cost_estimate=pl.CostEstimate(
            flops=flops, transcendentals=0, bytes_accessed=bytes_accessed),
    )(csi, pa, w1c, b1f, w2c, b2f, w3c, b3f, w4c, b4f)

    return out[:batch]


def init_params(key):
    """Deterministic synthetic parameters with torch.nn.Linear-like init.

    Stored as (in, out) weights and (1, out) biases (transposed vs torch)."""
    dims = [(IN_DIM, H1), (H1, H2), (H2, H3), (H3, OUT_DIM)]
    params = []
    for i, (din, dout) in enumerate(dims):
        kw, kb, key = jax.random.split(jax.random.fold_in(key, i), 3)
        bound = 1.0 / jnp.sqrt(din)
        w = jax.random.uniform(kw, (din, dout), jnp.float32, -bound, bound)
        b = jax.random.uniform(kb, (1, dout), jnp.float32, -bound, bound)
        params.append((w, b))
    return params


def reference_forward(curr_pose, csi_ip, action, params):
    """Pure-JAX reference for correctness check."""
    x = jnp.concatenate(
        [csi_ip.astype(jnp.float32),
         curr_pose.astype(jnp.float32),
         action.astype(jnp.float32)], axis=1)
    (w1, b1), (w2, b2), (w3, b3), (w4, b4) = params
    x = jnp.maximum(x @ w1 + b1, 0.0)
    x = jnp.maximum(x @ w2 + b2, 0.0)
    x = jnp.maximum(x @ w3 + b3, 0.0)
    return x @ w4 + b4


# TODO(synk): only the forward pass is implemented; CrossEntropyLoss / Adam /
# the training loop in `train()` are host-side training machinery, not kernels.

if __name__ == "__main__":
    key = jax.random.PRNGKey(0)
    k_pose, k_csi, k_act, k_params = jax.random.split(key, 4)

    batch = 64  # matches the torch DataLoader batch_size
    curr_pose = jax.random.normal(k_pose, (batch, POSE_DIM), jnp.float32)
    csi_ip = jax.random.normal(k_csi, (batch, CSI_DIM), jnp.float32)
    action = jax.random.normal(k_act, (batch, ACTION_DIM), jnp.float32)

    params = init_params(k_params)
    ref = reference_forward(curr_pose, csi_ip, action, params)

    # Default path: bf16 MXU operands, f32 accumulation (loose tolerance).
    logits = wifi_regrasp_forward(curr_pose, csi_ip, action, params)
    jax.block_until_ready(logits)
    assert logits.shape == (batch, OUT_DIM)
    assert jnp.allclose(logits, ref, atol=5e-2, rtol=5e-2), \
        "Pallas bf16 output mismatch vs reference"

    # Full-f32 MXU path (tight tolerance vs reference).
    logits_f32 = wifi_regrasp_forward(curr_pose, csi_ip, action, params,
                                      use_bf16=False)
    jax.block_until_ready(logits_f32)
    assert logits_f32.shape == (batch, OUT_DIM)
    assert jnp.allclose(logits_f32, ref, atol=1e-4, rtol=1e-4), \
        "Pallas f32 output mismatch vs reference"

    print("KERNEL_OK")
</pallas_src>

<mosaic_0001>
module attributes {stable_mosaic.version = 11 : i64} {
  func.func @kernel(%arg0: i32, %arg1: memref<32x108xf32, #tpu.memory_space<vmem>>, %arg2: memref<32x10xf32, #tpu.memory_space<vmem>>, %arg3: memref<128x118xbf16, #tpu.memory_space<vmem>>, %arg4: memref<1x118xf32, #tpu.memory_space<vmem>>, %arg5: memref<118x50xbf16, #tpu.memory_space<vmem>>, %arg6: memref<1x50xf32, #tpu.memory_space<vmem>>, %arg7: memref<50x10xbf16, #tpu.memory_space<vmem>>, %arg8: memref<1x10xf32, #tpu.memory_space<vmem>>, %arg9: memref<10x2xbf16, #tpu.memory_space<vmem>>, %arg10: memref<1x2xf32, #tpu.memory_space<vmem>>, %arg11: memref<32x2xf32, #tpu.memory_space<vmem>>, %arg12: memref<32x128xbf16, #tpu.memory_space<vmem>>) attributes {dimension_semantics = [#tpu.dimension_semantics<parallel>], iteration_bounds = array<i64: 2>, scalar_prefetch = 0 : i64, scratch_operands = 1 : i64, tpu.core_type = #tpu.core_type<tc>, window_params = [{transform_indices = @transform_0, window_bounds = array<i64: 32, 108>}, {transform_indices = @transform_1, window_bounds = array<i64: 32, 10>}, {pipeline_mode = #tpu.pipeline_mode<synchronous>, transform_indices = @transform_2, window_bounds = array<i64: 128, 118>}, {pipeline_mode = #tpu.pipeline_mode<synchronous>, transform_indices = @transform_3, window_bounds = array<i64: 1, 118>}, {pipeline_mode = #tpu.pipeline_mode<synchronous>, transform_indices = @transform_4, window_bounds = array<i64: 118, 50>}, {pipeline_mode = #tpu.pipeline_mode<synchronous>, transform_indices = @transform_5, window_bounds = array<i64: 1, 50>}, {pipeline_mode = #tpu.pipeline_mode<synchronous>, transform_indices = @transform_6, window_bounds = array<i64: 50, 10>}, {pipeline_mode = #tpu.pipeline_mode<synchronous>, transform_indices = @transform_7, window_bounds = array<i64: 1, 10>}, {pipeline_mode = #tpu.pipeline_mode<synchronous>, transform_indices = @transform_8, window_bounds = array<i64: 10, 2>}, {pipeline_mode = #tpu.pipeline_mode<synchronous>, transform_indices = @transform_9, window_bounds = array<i64: 1, 2>}, {transform_indices = @transform_10, window_bounds = array<i64: 32, 2>}]} {
    %c0 = arith.constant 0 : index
    %c0_0 = arith.constant 0 : index
    %0 = vector.load %arg1[%c0, %c0_0] : memref<32x108xf32, #tpu.memory_space<vmem>>, vector<32x108xf32>
    %1 = arith.truncf %0 : vector<32x108xf32> to vector<32x108xbf16>
    %c0_1 = arith.constant 0 : index
    %c0_2 = arith.constant 0 : index
    %2 = vector.load %arg12[%c0_1, %c0_2] : memref<32x128xbf16, #tpu.memory_space<vmem>>, vector<32x108xbf16>
    tpu.vector_store %arg12[%c0_1, %c0_2], %1 {strides = array<i32>} : memref<32x128xbf16, #tpu.memory_space<vmem>>, vector<32x108xbf16>,
    %c0_3 = arith.constant 0 : index
    %c0_4 = arith.constant 0 : index
    %3 = vector.load %arg2[%c0_3, %c0_4] : memref<32x10xf32, #tpu.memory_space<vmem>>, vector<32x10xf32>
    %4 = arith.truncf %3 : vector<32x10xf32> to vector<32x10xbf16>
    %c0_5 = arith.constant 0 : index
    %c108 = arith.constant 108 : index
    %5 = vector.load %arg12[%c0_5, %c108] : memref<32x128xbf16, #tpu.memory_space<vmem>>, vector<32x10xbf16>
    tpu.vector_store %arg12[%c0_5, %c108], %4 {strides = array<i32>} : memref<32x128xbf16, #tpu.memory_space<vmem>>, vector<32x10xbf16>,
    %cst = arith.constant 0.000000e+00 : bf16
    %6 = vector.broadcast %cst : bf16 to vector<32x10xbf16>
    %c0_6 = arith.constant 0 : index
    %c118 = arith.constant 118 : index
    %7 = vector.load %arg12[%c0_6, %c118] : memref<32x128xbf16, #tpu.memory_space<vmem>>, vector<32x10xbf16>
    tpu.vector_store %arg12[%c0_6, %c118], %6 {strides = array<i32>} : memref<32x128xbf16, #tpu.memory_space<vmem>>, vector<32x10xbf16>,
    %c0_7 = arith.constant 0 : index
    %c0_8 = arith.constant 0 : index
    %8 = vector.load %arg12[%c0_7, %c0_8] : memref<32x128xbf16, #tpu.memory_space<vmem>>, vector<32x128xbf16>
    %c0_9 = arith.constant 0 : index
    %c0_10 = arith.constant 0 : index
    %9 = vector.load %arg3[%c0_9, %c0_10] : memref<128x118xbf16, #tpu.memory_space<vmem>>, vector<128x118xbf16>
    %cst_11 = arith.constant dense<0.000000e+00> : vector<32x118xf32>
    %10 = tpu.matmul %8, %9, %cst_11 {dimension_numbers = #tpu.dot_dimension_numbers<[1], [0], [0], [1], [0, 0, 1, 1], [], []>} : vector<32x128xbf16>, vector<128x118xbf16>, vector<32x118xf32> -> vector<32x118xf32>
    %c0_12 = arith.constant 0 : index
    %c0_13 = arith.constant 0 : index
    %11 = vector.load %arg4[%c0_12, %c0_13] : memref<1x118xf32, #tpu.memory_space<vmem>>, vector<1x118xf32>
    %12 = vector.broadcast %11 : vector<1x118xf32> to vector<32x118xf32>
    %13 = arith.addf %10, %12 : vector<32x118xf32>
    %cst_14 = arith.constant 0.000000e+00 : f32
    %14 = vector.broadcast %cst_14 : f32 to vector<32x118xf32>
    %15 = arith.maximumf %13, %14 : vector<32x118xf32>
    %16 = arith.truncf %15 : vector<32x118xf32> to vector<32x118xbf16>
    %c0_15 = arith.constant 0 : index
    %c0_16 = arith.constant 0 : index
    %17 = vector.load %arg5[%c0_15, %c0_16] : memref<118x50xbf16, #tpu.memory_space<vmem>>, vector<118x50xbf16>
    %cst_17 = arith.constant dense<0.000000e+00> : vector<32x50xf32>
    %18 = tpu.matmul %16, %17, %cst_17 {dimension_numbers = #tpu.dot_dimension_numbers<[1], [0], [0], [1], [0, 0, 1, 1], [], []>} : vector<32x118xbf16>, vector<118x50xbf16>, vector<32x50xf32> -> vector<32x50xf32>
    %c0_18 = arith.constant 0 : index
    %c0_19 = arith.constant 0 : index
    %19 = vector.load %arg6[%c0_18, %c0_19] : memref<1x50xf32, #tpu.memory_space<vmem>>, vector<1x50xf32>
    %20 = vector.broadcast %19 : vector<1x50xf32> to vector<32x50xf32>
    %21 = arith.addf %18, %20 : vector<32x50xf32>
    %cst_20 = arith.constant 0.000000e+00 : f32
    %22 = vector.broadcast %cst_20 : f32 to vector<32x50xf32>
    %23 = arith.maximumf %21, %22 : vector<32x50xf32>
    %24 = arith.truncf %23 : vector<32x50xf32> to vector<32x50xbf16>
    %c0_21 = arith.constant 0 : index
    %c0_22 = arith.constant 0 : index
    %25 = vector.load %arg7[%c0_21, %c0_22] : memref<50x10xbf16, #tpu.memory_space<vmem>>, vector<50x10xbf16>
    %cst_23 = arith.constant dense<0.000000e+00> : vector<32x10xf32>
    %26 = tpu.matmul %24, %25, %cst_23 {dimension_numbers = #tpu.dot_dimension_numbers<[1], [0], [0], [1], [0, 0, 1, 1], [], []>} : vector<32x50xbf16>, vector<50x10xbf16>, vector<32x10xf32> -> vector<32x10xf32>
    %c0_24 = arith.constant 0 : index
    %c0_25 = arith.constant 0 : index
    %27 = vector.load %arg8[%c0_24, %c0_25] : memref<1x10xf32, #tpu.memory_space<vmem>>, vector<1x10xf32>
    %28 = vector.broadcast %27 : vector<1x10xf32> to vector<32x10xf32>
    %29 = arith.addf %26, %28 : vector<32x10xf32>
    %cst_26 = arith.constant 0.000000e+00 : f32
    %30 = vector.broadcast %cst_26 : f32 to vector<32x10xf32>
    %31 = arith.maximumf %29, %30 : vector<32x10xf32>
    %32 = arith.truncf %31 : vector<32x10xf32> to vector<32x10xbf16>
    %c0_27 = arith.constant 0 : index
    %c0_28 = arith.constant 0 : index
    %33 = vector.load %arg9[%c0_27, %c0_28] : memref<10x2xbf16, #tpu.memory_space<vmem>>, vector<10x2xbf16>
    %cst_29 = arith.constant dense<0.000000e+00> : vector<32x2xf32>
    %34 = tpu.matmul %32, %33, %cst_29 {dimension_numbers = #tpu.dot_dimension_numbers<[1], [0], [0], [1], [0, 0, 1, 1], [], []>} : vector<32x10xbf16>, vector<10x2xbf16>, vector<32x2xf32> -> vector<32x2xf32>
    %c0_30 = arith.constant 0 : index
    %c0_31 = arith.constant 0 : index
    %35 = vector.load %arg10[%c0_30, %c0_31] : memref<1x2xf32, #tpu.memory_space<vmem>>, vector<1x2xf32>
    %36 = vector.broadcast %35 : vector<1x2xf32> to vector<32x2xf32>
    %37 = arith.addf %34, %36 : vector<32x2xf32>
    %c0_32 = arith.constant 0 : index
    %c0_33 = arith.constant 0 : index
    %38 = vector.load %arg11[%c0_32, %c0_33] : memref<32x2xf32, #tpu.memory_space<vmem>>, vector<32x2xf32>
    tpu.vector_store %arg11[%c0_32, %c0_33], %37 {strides = array<i32>} : memref<32x2xf32, #tpu.memory_space<vmem>>, vector<32x2xf32>,
    return
  }
  func.func @transform_0(%arg0: i32) -> (i32, i32) {
    %c0_i32 = arith.constant 0 : i32
    %c0_i32_0 = arith.constant 0 : i32
    return %arg0, %c0_i32 : i32, i32
  }
  func.func @transform_1(%arg0: i32) -> (i32, i32) {
    %c0_i32 = arith.constant 0 : i32
    %c0_i32_0 = arith.constant 0 : i32
    return %arg0, %c0_i32 : i32, i32
  }
  func.func @transform_2(%arg0: i32) -> (i32, i32) {
    %c0_i32 = arith.constant 0 : i32
    %c0_i32_0 = arith.constant 0 : i32
    %c0_i32_1 = arith.constant 0 : i32
    return %c0_i32, %c0_i32_0 : i32, i32
  }
  func.func @transform_3(%arg0: i32) -> (i32, i32) {
    %c0_i32 = arith.constant 0 : i32
    %c0_i32_0 = arith.constant 0 : i32
    %c0_i32_1 = arith.constant 0 : i32
    return %c0_i32, %c0_i32_0 : i32, i32
  }
  func.func @transform_4(%arg0: i32) -> (i32, i32) {
    %c0_i32 = arith.constant 0 : i32
    %c0_i32_0 = arith.constant 0 : i32
    %c0_i32_1 = arith.constant 0 : i32
    return %c0_i32, %c0_i32_0 : i32, i32
  }
  func.func @transform_5(%arg0: i32) -> (i32, i32) {
    %c0_i32 = arith.constant 0 : i32
    %c0_i32_0 = arith.constant 0 : i32
    %c0_i32_1 = arith.constant 0 : i32
    return %c0_i32, %c0_i32_0 : i32, i32
  }
  func.func @transform_6(%arg0: i32) -> (i32, i32) {
    %c0_i32 = arith.constant 0 : i32
    %c0_i32_0 = arith.constant 0 : i32
    %c0_i32_1 = arith.constant 0 : i32
    return %c0_i32, %c0_i32_0 : i32, i32
  }
  func.func @transform_7(%arg0: i32) -> (i32, i32) {
    %c0_i32 = arith.constant 0 : i32
    %c0_i32_0 = arith.constant 0 : i32
    %c0_i32_1 = arith.constant 0 : i32
    return %c0_i32, %c0_i32_0 : i32, i32
  }
  func.func @transform_8(%arg0: i32) -> (i32, i32) {
    %c0_i32 = arith.constant 0 : i32
    %c0_i32_0 = arith.constant 0 : i32
    %c0_i32_1 = arith.constant 0 : i32
    return %c0_i32, %c0_i32_0 : i32, i32
  }
  func.func @transform_9(%arg0: i32) -> (i32, i32) {
    %c0_i32 = arith.constant 0 : i32
    %c0_i32_0 = arith.constant 0 : i32
    %c0_i32_1 = arith.constant 0 : i32
    return %c0_i32, %c0_i32_0 : i32, i32
  }
  func.func @transform_10(%arg0: i32) -> (i32, i32) {
    %c0_i32 = arith.constant 0 : i32
    %c0_i32_0 = arith.constant 0 : i32
    return %arg0, %c0_i32 : i32, i32
  }
}

</mosaic_0001>

<bundles_post_ra>
// kernel: wifi_regrasp_forward.1
= control target key start
LH: loop header
LB: loop body
LE: loop exit
PB: predicated region body
PF: predicated region fallthrough
CT: control target
= control target key end

     0   :  { %s1027_s13 = smov 0   ;;  %s1142_s0 = inlined_call_operand.vmem [shape: f32[64,108], index: 0, kind: input, shape index: {}]   ;;  %s1143_s1 = inlined_call_operand.vmem [shape: f32[64,10], index: 1, kind: input, shape index: {}]   ;;  %s1144_s2 = inlined_call_operand.vmem [shape: bf16[128,118], index: 2, kind: input, shape index: {}]   ;;  %s1145_s3 = inlined_call_operand.vmem [shape: f32[1,118], index: 3, kind: input, shape index: {}]   ;;  %s1146_s4 = inlined_call_operand.vmem [shape: bf16[118,50], index: 4, kind: input, shape index: {}]   ;;  %s1147_s5 = inlined_call_operand.vmem [shape: f32[1,50], index: 5, kind: input, shape index: {}]   ;;  %s1148_s6 = inlined_call_operand.vmem [shape: bf16[50,10], index: 6, kind: input, shape index: {}]   ;;  %s1149_s7 = inlined_call_operand.vmem [shape: f32[1,10], index: 7, kind: input, shape index: {}]   ;;  %s1150_s8 = inlined_call_operand.vmem [shape: bf16[10,2], index: 8, kind: input, shape index: {}]   ;;  %s1151_s9 = inlined_call_operand.vmem [shape: f32[1,2], index: 9, kind: input, shape index: {}]   ;;  %s1152_s10 = inlined_call_operand.vmem [shape: f32[64,2], index: 10, kind: output, shape index: {}]  }
   0x1 LB: > { %s824_s14 = sadd.s32 4294967295, %s968_s13   ;;  %p828_p0 = scmp.ge.s32.totalorder %s968_s13, 1  ;;  %s968_s13 = sphi %s1027_s13, %s20_s13  }
   0x2   : > { %p324_p1 = scmp.lt.s32.totalorder %s968_s13, 3 }
   0x4   : > { %p325_p2 = pnand %p828_p0, %p324_p1 }
   0x5   : > { %s829_s15 = sshll.u32 (!%p325_p2), %s824_s14, 2  ;;  %s970_s26 = smov (!%p325_p2), 108  }
   0x6   : > { %328 = sbr.rel (%p325_p2) target bundleno = 734 (0x2de), region = 60  ;;  %p368_p3 = scmp.lt.s32.totalorder (!%p325_p2), %s829_s15, 7 }
   0xb   : > { %v936_v0 = vld [vmem:[%s1144_s2 + $0x38] sm:$0xff]  ;;  %v935_v1 = vld [vmem:[%s1144_s2 + $0x30] sm:$0xff]  ;;  %s1154_s15 = smov (!%p368_p3, %s829_s15), 7  ;;  %v934_v4 = vld [vmem:[%s1144_s2 + $0x28] sm:$0xff]  ;;  %vm394_vm0 = vcmask 879616   ;;  %vm423_vm1 = vcmask 962400  }
   0xc   : > { %517 = vmatpush.bf16.msra.mxu0 %v936_v0  ;;  %s1041_s20 = sshll.u32 %s1154_s15, 3  ;;  %v933_v13 = vld [vmem:[%s1144_s2 + $0x20] sm:$0xff]  ;;  %v932_v14 = vld [vmem:[%s1144_s2 + $0x18] sm:$0xff]  ;;  %v931_v17 = vld [vmem:[%s1144_s2 + $0x10] sm:$0xff]  ;;  %vm428_vm2 = vcmask 1044400   ;;  %v971_v26 = vmov 0  }
   0xd   : > { %s377_s23 = scalar_lea.vmem %s1143_s1, %s1041_s20  ;;  %s371_s29 = scalar_lea.vmem %s1142_s0, %s1041_s20  ;;  %v930_v18 = vld [vmem:[%s1144_s2 + $0x8] sm:$0xff]  ;;  %v929_v21 = vld [vmem:[%s1144_s2] sm:$0xff]  ;;  %v556_v27 = vld [vmem:[%s1146_s4 + $0x38] sm:$0x7]  ;;  %vm613_vm3 = vcmask 1042432   ;;  %vm606_vm4 = vcmask 965632  }
   0xe   : > { %v399_v2 = vld [vmem:[%s377_s23] sm:$0xff]  ;;  %v401_v3 = vld [vmem:[%s377_s23 + $0x10] sm:$0xff]  ;;  %v400_v7 = vld [vmem:[%s377_s23 + $0x8] sm:$0xff]  ;;  %v590_v28 = vunpack.c.l.b16 %v556_v27  ;;  %vm681_vm5 = vcmask 1040384   ;;  %vm674_vm6 = vcmask 408576   ;;  %vm728_vm7 = vcmask 1044480   ;;  %s383_s24 = scalar_lea.vmem %s1152_s10, %s1041_s20 }
   0xf   : > { %v403_v5 = vpack.c.bf16 %v399_v2, %v399_v2  ;;  %v405_v6 = vpack.c.bf16 %v401_v3, %v401_v3  ;;  %v402_v8 = vld [vmem:[%s377_s23 + $0x18] sm:$0xff]  ;;  %v404_v9 = vpack.c.bf16 %v400_v7, %v400_v7  ;;  %v386_v11 = vld [vmem:[%s371_s29] sm:$0xff]  ;;  %v387_v15 = vld [vmem:[%s371_s29 + $0x8] sm:$0xff]  ;;  %vm721_vm8 = vcmask 80896  }
  0x10   : > { %518 = vmatpush.bf16.msra.mxu0 %v935_v1  ;;  %v406_v10 = vpack.c.bf16 %v402_v8, %v402_v8  ;;  %v390_v12 = vpack.c.bf16 %v386_v11, %v386_v11  ;;  %v391_v16 = vpack.c.bf16 %v387_v15, %v387_v15  ;;  %v388_v19 = vld [vmem:[%s371_s29 + $0x10] sm:$0xff]  ;;  %v389_v22 = vld [vmem:[%s371_s29 + $0x18] sm:$0xff]  ;;  %v598_v29 = vpack.c.b16 %v590_v28, %v590_v28  ;;  %v942_v34 = vld [vmem:[%s1146_s4 + $0x28] sm:$0xff] }
  0x11   : > { %411 = vrot.lane.b32.xlu0 %v403_v5, %s970_s26  ;;  %415 = vrot.lane.b32.xlu1 %v405_v6, %s970_s26  ;;  %v392_v20 = vpack.c.bf16 %v388_v19, %v388_v19  ;;  %v393_v23 = vpack.c.bf16 %v389_v22, %v389_v22  ;;  %v943_v33 = vld [vmem:[%s1146_s4 + $0x30] sm:$0xff]  ;;  %v941_v36 = vld [vmem:[%s1146_s4 + $0x20] sm:$0xff]  ;;  %vm751_vm9 = vcmask 15360  }
  0x12   : > { %395 = vst.msk [vmem:[#allocation2] sm:$0xf] %vm394_vm0, %v390_v12  ;;  %v615_v32 = vsel %vm613_vm3, %v598_v29, 0  ;;  %v940_v38 = vld [vmem:[%s1146_s4 + $0x18] sm:$0xff]  ;;  %v939_v39 = vld [vmem:[%s1146_s4 + $0x10] sm:$0xff]  ;;  %v938_v40 = vld [vmem:[%s1146_s4 + $0x8] sm:$0xff] }
  0x13   : > { %396 = vst.msk [vmem:[#allocation2 + $0x4] sm:$0xf] %vm394_vm0, %v391_v16  ;;  %617 = vmatpush.bf16.msra.mxu1 %v615_v32  ;;  %v937_v41 = vld [vmem:[%s1146_s4] sm:$0xff]  ;;  %v648_v57 = vld [vmem:[%s1148_s6 + $0x18] sm:$0x1]  ;;  %v946_v61 = vld [vmem:[%s1148_s6 + $0x10] sm:$0xff] }
  0x14   : > { %519 = vmatpush.bf16.msra.mxu0 %v934_v4  ;;  %397 = vst.msk [vmem:[#allocation2 + $0x8] sm:$0xf] %vm394_vm0, %v392_v20  ;;  %v958_v43 = vld [vmem:[%s1145_s3] ss:$0 sm:$0xff]  ;;  %v666_v58 = vunpack.c.l.b16 %v648_v57  ;;  %v945_v62 = vld [vmem:[%s1148_s6 + $0x8] sm:$0xff] }
  0x15   : > { %398 = vst.msk [vmem:[#allocation2 + $0xc] sm:$0xf] %vm394_vm0, %v393_v23  ;;  %v944_v63 = vld [vmem:[%s1148_s6] sm:$0xff] }
  0x16   : > { %v670_v59 = vpack.c.b16 %v666_v58, %v666_v58  ;;  %v959_v1 = vld [vmem:[%s1147_s5] ss:$0 sm:$0xff]  ;;  %v947_v16 = vld [vmem:[%s1150_s8] sm:$0x10] }
  0x17   : > { %618 = vmatpush.bf16.msra.mxu1 %v943_v33  ;;  %v921_v15 = vld [vmem:[%s1150_s8] sm:$0xf] }
  0x18   : > { %520 = vmatpush.bf16.msra.mxu0 %v933_v13  ;;  %v683_v60 = vsel %vm681_vm5, %v670_v59, 0  ;;  %v960_v20 = vld [vmem:[%s1149_s7] ss:$0 sm:$0xff] }
  0x19   : > { %413 = vrot.lane.b32.xlu0 %v404_v9, %s970_s26  ;;  %417 = vrot.lane.b32.xlu1 %v406_v10, %s970_s26 }
  0x1a   : > { %689 = vmatpush.bf16.msra.mxu2 %v683_v60 }
  0x1b   : > { %619 = vmatpush.bf16.msra.mxu1 %v942_v34  ;;  %v961_v34 = vld [vmem:[%s1151_s9] ss:$0 sm:$0xff] }
  0x1c   : > { %521 = vmatpush.bf16.msra.mxu0 %v932_v14 }
  0x1e   : > { %690 = vmatpush.bf16.msra.mxu2 %v946_v61 }
  0x1f   : > { %620 = vmatpush.bf16.msra.mxu1 %v941_v36 }
  0x20   : > { %522 = vmatpush.bf16.msra.mxu0 %v931_v17  ;;  %v922_v17 = vor.u32 %v947_v16, %v921_v15 }
  0x22   : > { %691 = vmatpush.bf16.msra.mxu2 %v945_v62 }
  0x23   : > { %621 = vmatpush.bf16.msra.mxu1 %v940_v38 }
  0x24   : > { %523 = vmatpush.bf16.msra.mxu0 %v930_v18  ;;  %v730_v18 = vsel %vm728_vm7, %v922_v17, 0 }
  0x25   : > { %739 = vmatpush.bf16.msra.mxu3 %v730_v18 }
  0x26   : > { %692 = vmatpush.bf16.msra.mxu2 %v944_v63 }
  0x27   : > { %622 = vmatpush.bf16.msra.mxu1 %v939_v39 }
  0x28   : > { %524 = vmatpush.bf16.msra.mxu0 %v929_v21 }
  0x2b   : > { %623 = vmatpush.bf16.msra.mxu1 %v938_v40 }
  0x2f   : > { %624 = vmatpush.bf16.msra.mxu1 %v937_v41 }
  0x83   : > { %v412_v24 = vpop.permute.xlu0 %411  ;;  %v416_v25 = vpop.permute.xlu1 %415 }
  0x84   : > { %424 = vst.msk [vmem:[#allocation2] sm:$0xf] %vm423_vm1, %v412_v24 }
  0x85   : > { %429 = vst.msk [vmem:[#allocation2] sm:$0xf] %vm428_vm2, %v971_v26 }
  0x86   : > { %426 = vst.msk [vmem:[#allocation2 + $0x8] sm:$0xf] %vm423_vm1, %v416_v25 }
  0x87   : > { %431 = vst.msk [vmem:[#allocation2 + $0x8] sm:$0xf] %vm428_vm2, %v971_v26 }
  0x8b   : > { %v414_v30 = vpop.permute.xlu0 %413  ;;  %v418_v31 = vpop.permute.xlu1 %417 }
  0x8c   : > { %425 = vst.msk [vmem:[#allocation2 + $0x4] sm:$0xf] %vm423_vm1, %v414_v30 }
  0x8d   : > { %430 = vst.msk [vmem:[#allocation2 + $0x4] sm:$0xf] %vm428_vm2, %v971_v26 }
  0x8e   : > { %427 = vst.msk [vmem:[#allocation2 + $0xc] sm:$0xf] %vm423_vm1, %v418_v31 }
  0x8f   : > { %432 = vst.msk [vmem:[#allocation2 + $0xc] sm:$0xf] %vm428_vm2, %v971_v26 }
  0x94   : > { %v927_v35 = vld [vmem:[#allocation2] sm:$0xff] }
  0x95   : > { %525 = vmatmul.bf16.vlgmr.msra.gmra.mxu0 %v927_v35 }
  0x96   : > { %v928_v37 = vld [vmem:[#allocation2 + $0x8] sm:$0xff] }
  0xa5   : > { %530 = vmatmul.bf16.gmra.mxu0 %v928_v37 }
 0x112   : > { %v526_v42 = vpop.f32.mrf.mxu0 }
 0x113   : > { %v527_v44 = vadd.f32 %v958_v43, %v526_v42 }
 0x115   : > { %v536_v47 = vmax.f32 %v527_v44, 0.0 }
 0x11a   : > { %v528_v45 = vpop.f32.mrf.mxu0 }
 0x11b   : > { %v529_v46 = vadd.f32 %v958_v43, %v528_v45 }
 0x11d   : > { %v537_v48 = vmax.f32 %v529_v46, 0.0 }
 0x11f   : > { %v540_v49 = vpack.c.bf16 %v537_v48, %v536_v47 }
 0x121   : > { %903 = vmatmul.msk.bf16.vlgmr.msra.gmra.mxu1 %vm606_vm4, %v540_v49 }
 0x122   : > { %v531_v50 = vpop.f32.mrf.mxu0 }
 0x123   : > { %v532_v51 = vadd.f32 %v958_v43, %v531_v50 }
 0x125   : > { %v538_v54 = vmax.f32 %v532_v51, 0.0 }
 0x12a   : > { %v533_v52 = vpop.f32.mrf.mxu0 }
 0x12b   : > { %v534_v53 = vadd.f32 %v958_v43, %v533_v52 }
 0x12d   : > { %v539_v55 = vmax.f32 %v534_v53, 0.0 }
 0x12f   : > { %v541_v56 = vpack.c.bf16 %v539_v55, %v538_v54 }
 0x131   : > { %904 = vmatmul.msk.bf16.gmra.mxu1 %vm606_vm4, %v541_v56 }
 0x19e   : > { %v626_v0 = vpop.f32.mrf.mxu1 }
 0x19f   : > { %v627_v2 = vadd.f32 %v959_v1, %v626_v0 }
 0x1a1   : > { %v636_v5 = vmax.f32 %v627_v2, 0.0 }
 0x1a6   : > { %v628_v3 = vpop.f32.mrf.mxu1 }
 0x1a7   : > { %v629_v4 = vadd.f32 %v959_v1, %v628_v3 }
 0x1a9   : > { %v637_v6 = vmax.f32 %v629_v4, 0.0 }
 0x1ab   : > { %v640_v7 = vpack.c.bf16 %v637_v6, %v636_v5 }
 0x1ad   : > { %917 = vmatmul.msk.bf16.vlgmr.msra.gmra.mxu2 %vm674_vm6, %v640_v7 }
 0x1ae   : > { %v631_v8 = vpop.f32.mrf.mxu1 }
 0x1af   : > { %v632_v9 = vadd.f32 %v959_v1, %v631_v8 }
 0x1b1   : > { %v638_v12 = vmax.f32 %v632_v9, 0.0 }
 0x1b6   : > { %v633_v10 = vpop.f32.mrf.mxu1 }
 0x1b7   : > { %v634_v11 = vadd.f32 %v959_v1, %v633_v10 }
 0x1b9   : > { %v639_v13 = vmax.f32 %v634_v11, 0.0 }
 0x1bb   : > { %v641_v14 = vpack.c.bf16 %v639_v13, %v638_v12 }
 0x1bd   : > { %918 = vmatmul.msk.bf16.gmra.mxu2 %vm674_vm6, %v641_v14 }
 0x230   : > { %v694_v19 = vpop.f32.mrf.mxu2 }
 0x231   : > { %v695_v21 = vadd.f32 %v960_v20, %v694_v19 }
 0x233   : > { %v704_v24 = vmax.f32 %v695_v21, 0.0 }
 0x238   : > { %v696_v22 = vpop.f32.mrf.mxu2 }
 0x239   : > { %v697_v23 = vadd.f32 %v960_v20, %v696_v22 }
 0x23b   : > { %v705_v25 = vmax.f32 %v697_v23, 0.0 }
 0x23d   : > { %v708_v26 = vpack.c.bf16 %v705_v25, %v704_v24 }
 0x23f   : > { %923 = vmatmul.msk.bf16.vlgmr.msra.gmra.mxu3 %vm721_vm8, %v708_v26 }
 0x240   : > { %v699_v27 = vpop.f32.mrf.mxu2 }
 0x241   : > { %v700_v28 = vadd.f32 %v960_v20, %v699_v27 }
 0x243   : > { %v706_v31 = vmax.f32 %v700_v28, 0.0 }
 0x248   : > { %v701_v29 = vpop.f32.mrf.mxu2 }
 0x249   : > { %v702_v30 = vadd.f32 %v960_v20, %v701_v29 }
 0x24b   : > { %v707_v32 = vmax.f32 %v702_v30, 0.0 }
 0x24d   : > { %v709_v33 = vpack.c.bf16 %v707_v32, %v706_v31 }
 0x24f   : > { %924 = vmatmul.msk.bf16.gmra.mxu3 %vm721_vm8, %v709_v33 }
 0x2c2   : > { %v741_v35 = vpop.f32.mrf.mxu3 }
 0x2c3   : > { %v742_v36 = vadd.f32 %v961_v34, %v741_v35 }
 0x2c5   : > { %752 = vst.msk [vmem:[%s383_s24] sm:$0xff] %vm751_vm9, %v742_v36 }
 0x2ca   : > { %v743_v37 = vpop.f32.mrf.mxu3 }
 0x2cb   : > { %v744_v38 = vadd.f32 %v961_v34, %v743_v37 }
 0x2cd   : > { %753 = vst.msk [vmem:[%s383_s24 + $0x8] sm:$0xff] %vm751_vm9, %v744_v38 }
 0x2d2   : > { %v746_v39 = vpop.f32.mrf.mxu3 }
 0x2d3   : > { %v747_v40 = vadd.f32 %v961_v34, %v746_v39 }
 0x2d5   : > { %754 = vst.msk [vmem:[%s383_s24 + $0x10] sm:$0xff] %vm751_vm9, %v747_v40 }
 0x2da   : > { %v748_v41 = vpop.f32.mrf.mxu3 }
 0x2db   : > { %v749_v42 = vadd.f32 %v961_v34, %v748_v41 }
 0x2dd   : > { %755 = vst.msk [vmem:[%s383_s24 + $0x18] sm:$0xff] %vm751_vm9, %v749_v42 }
 0x2de PF: > { %s20_s13 = sadd.s32 1, %s968_s13  }
 0x2df   : > { %p17_p4 = scmp.ge.s32.totalorder %s20_s13, 4  }
 0x2e1   :  { %19 = sbr.rel (!%p17_p4) target bundleno = 1 (0x1), region = 93 }

</bundles_post_ra>
